<compile_context>
chip_gen: v7x
topology: tpu7x:2x2x1
jax: 0.10.0
libtpu: 0.0.40
codegen_flags: <defaults>
</compile_context>

<pallas_src>
import functools

import jax
import jax.numpy as jnp
from jax.experimental import pallas as pl
from jax.experimental.pallas import tpu as pltpu


def lstm_fc_kernel(tok_ref, proj_ref, whh_ref, wfc_ref, bfc_ref, out_ref):
    TB = tok_ref.shape[0]            # T * Bp
    VOCAB = proj_ref.shape[0]
    H = whh_ref.shape[0]
    Bp = out_ref.shape[0]
    T = TB // Bp

    # --- Embedding gather + input projection, fused: one-hot MXU matmul. ---
    # Exact: each one-hot row has a single 1.0, so the f32 matmul reproduces
    # the projected-embedding row bit-for-bit.  Row index = t*Bp + b, so the
    # per-step slice below is a static, sublane-group-aligned (Bp, 4H) window.
    # (For a large vocab this should become a DMA gather instead.)
    iota = jax.lax.broadcasted_iota(jnp.int32, (TB, VOCAB), 1)
    onehot = (iota == tok_ref[...]).astype(jnp.float32)        # (T*Bp, VOCAB)
    xproj = jnp.dot(onehot, proj_ref[...],
                    preferred_element_type=jnp.float32)        # (T*Bp, 4H)

    whh = whh_ref[...]               # (H, 4H) bf16, loaded once

    h = jnp.zeros((Bp, H), jnp.float32)
    c = jnp.zeros((Bp, H), jnp.float32)
    hs = []
    # T is small and static -> fully unrolled recurrence for the LLO scheduler.
    for t in range(T):
        xp_t = xproj[t * Bp:(t + 1) * Bp, :]                   # (Bp, 4H)
        gates = xp_t + jnp.dot(h.astype(jnp.bfloat16), whh,
                               preferred_element_type=jnp.float32)
        # PyTorch gate order [i, f, g, o].  One sigmoid over the full vreg
        # covers i/f/o (g lanes are free riders); tanh only on the g slice.
        sg = jax.nn.sigmoid(gates)                             # (Bp, 4H)
        i_g = sg[:, 0:H]
        f_g = sg[:, H:2 * H]
        o_g = sg[:, 3 * H:4 * H]
        g_g = jnp.tanh(gates[:, 2 * H:3 * H])
        c = f_g * c + i_g * g_g
        h = o_g * jnp.tanh(c)
        hs.append(h)

    # fc1 as ONE (Bp, T*H) @ (T*H, Op) bf16 matmul (f32 accumulate); concat
    # order (index = t*H + h) matches batch_first=True reshape(-1, H*T).
    flat = jnp.concatenate(hs, axis=-1).astype(jnp.bfloat16)   # (Bp, T*H)
    out_ref[...] = (jnp.dot(flat, wfc_ref[...],
                            preferred_element_type=jnp.float32)
                    + bfc_ref[...])                            # (Bp, Op)


def prepare_params(emb, w_ih, w_hh, b_ih, b_hh, w_fc, b_fc, out_pad=128):
    """One-time host prep: fold embedding/bias into a projection table,
    transpose weights, cast MXU operands to bf16, lane-pad the fc output."""
    proj = (emb.astype(jnp.float32) @ w_ih.T.astype(jnp.float32)
            + (b_ih + b_hh).astype(jnp.float32))               # (VOCAB, 4H) f32
    whh_t = w_hh.T.astype(jnp.bfloat16)                        # (H, 4H) bf16
    O, TH = w_fc.shape
    wfc_t = jnp.zeros((TH, out_pad), jnp.bfloat16)
    wfc_t = wfc_t.at[:, :O].set(w_fc.T.astype(jnp.bfloat16))   # (T*H, Op) bf16
    bfc = jnp.zeros((1, out_pad), jnp.float32).at[:, :O].set(b_fc.astype(jnp.float32))
    return proj, whh_t, wfc_t, bfc


@functools.partial(jax.jit, static_argnames=("out_size",))
def my_model_forward(tokens, proj, whh_t, wfc_t, bfc, out_size):
    """Embedding -> single-layer LSTM -> fc1, fused in a single Pallas call."""
    B, T = tokens.shape
    Op = wfc_t.shape[1]

    # Pad batch up to a full sublane group (8) for vreg/MXU occupancy.
    Bp = max(8, ((B + 7) // 8) * 8)

    # Lay tokens out t-major / b-minor so per-step slices inside the kernel
    # are contiguous sublane groups.  Pad rows use token id 0 (discarded).
    tok = jnp.transpose(tokens.astype(jnp.int32))              # (T, B)
    tok = jnp.pad(tok, ((0, 0), (0, Bp - B)))                  # (T, Bp)
    tok = tok.reshape(T * Bp, 1)                               # (T*Bp, 1)

    vmem = pl.BlockSpec(memory_space=pltpu.MemorySpace.VMEM)

    out = pl.pallas_call(
        lstm_fc_kernel,
        out_shape=jax.ShapeDtypeStruct((Bp, Op), jnp.float32),
        in_specs=[vmem] * 5,
        out_specs=vmem,
    )(tok, proj, whh_t, wfc_t, bfc)

    return out[:B, :out_size]


def reference_forward(tokens, emb, w_ih, w_hh, b_ih, b_hh, w_fc, b_fc):
    xe = jnp.take(emb, tokens, axis=0)
    B, T, D = xe.shape
    H = w_hh.shape[1]
    h = jnp.zeros((B, H), jnp.float32)
    c = jnp.zeros((B, H), jnp.float32)
    outs = []
    for t in range(T):
        gates = xe[:, t] @ w_ih.T + b_ih + h @ w_hh.T + b_hh
        i = jax.nn.sigmoid(gates[:, :H])
        f = jax.nn.sigmoid(gates[:, H:2 * H])
        g = jnp.tanh(gates[:, 2 * H:3 * H])
        o = jax.nn.sigmoid(gates[:, 3 * H:])
        c = f * c + i * g
        h = o * jnp.tanh(c)
        outs.append(h)
    flat = jnp.concatenate(outs, axis=-1)        # (B, T*H) == reshape(-1, H*T)
    return flat @ w_fc.T + b_fc


if __name__ == "__main__":
    # Small shapes implied by the module:
    VOCAB = 64          # embedding vocab
    D = 32              # embedding_dim == LSTM input_size
    H = 32              # hidden_size
    T = 8               # context_size (sequence length)
    B = 2               # batch
    O = 16              # output_size

    key = jax.random.PRNGKey(0)
    ks = jax.random.split(key, 8)
    emb = jax.random.normal(ks[0], (VOCAB, D), jnp.float32) * 0.1
    w_ih = jax.random.normal(ks[1], (4 * H, D), jnp.float32) * 0.1
    w_hh = jax.random.normal(ks[2], (4 * H, H), jnp.float32) * 0.1
    b_ih = jax.random.normal(ks[3], (4 * H,), jnp.float32) * 0.1
    b_hh = jax.random.normal(ks[4], (4 * H,), jnp.float32) * 0.1
    w_fc = jax.random.normal(ks[5], (O, H * T), jnp.float32) * 0.1
    b_fc = jax.random.normal(ks[6], (O,), jnp.float32) * 0.1
    tokens = jax.random.randint(ks[7], (B, T), 0, VOCAB, jnp.int32)

    # One-time parameter prep (out of the per-call path).
    proj, whh_t, wfc_t, bfc = prepare_params(emb, w_ih, w_hh, b_ih, b_hh, w_fc, b_fc)

    out = my_model_forward(tokens, proj, whh_t, wfc_t, bfc, out_size=O)
    out = jax.block_until_ready(out)

    ref = reference_forward(tokens, emb, w_ih, w_hh, b_ih, b_hh, w_fc, b_fc)
    assert out.shape == (B, O)
    # bf16 MXU operands (f32 accumulation) -> slightly loosened tolerance.
    assert jnp.allclose(out, ref, rtol=1e-2, atol=5e-3), "mismatch vs reference"
    print("KERNEL_OK")
</pallas_src>

<mosaic_0001>
module attributes {stable_mosaic.version = 11 : i64} {
  func.func @lstm_fc_kernel(%arg0: memref<64x1xi32, #tpu.memory_space<vmem>>, %arg1: memref<64x128xf32, #tpu.memory_space<vmem>>, %arg2: memref<32x128xbf16, #tpu.memory_space<vmem>>, %arg3: memref<256x128xbf16, #tpu.memory_space<vmem>>, %arg4: memref<1x128xf32, #tpu.memory_space<vmem>>, %arg5: memref<8x128xf32, #tpu.memory_space<vmem>>) attributes {dimension_semantics = [], scalar_prefetch = 0 : i64, scratch_operands = 0 : i64, tpu.core_type = #tpu.core_type<tc>} {
    %0 = tpu.iota {dimensions = array<i32: 1>} : vector<64x64xi32>
    %c0 = arith.constant 0 : index
    %c0_0 = arith.constant 0 : index
    %1 = vector.load %arg0[%c0, %c0_0] : memref<64x1xi32, #tpu.memory_space<vmem>>, vector<64x1xi32>
    %2 = vector.broadcast %1 : vector<64x1xi32> to vector<64x64xi32>
    %3 = arith.cmpi eq, %0, %2 : vector<64x64xi32>
    %4 = arith.extui %3 : vector<64x64xi1> to vector<64x64xi32>
    %5 = arith.sitofp %4 : vector<64x64xi32> to vector<64x64xf32>
    %c0_1 = arith.constant 0 : index
    %c0_2 = arith.constant 0 : index
    %6 = vector.load %arg1[%c0_1, %c0_2] : memref<64x128xf32, #tpu.memory_space<vmem>>, vector<64x128xf32>
    %cst = arith.constant dense<0.000000e+00> : vector<64x128xf32>
    %7 = tpu.matmul %5, %6, %cst {dimension_numbers = #tpu.dot_dimension_numbers<[1], [0], [0], [1], [0, 0, 1, 1], [], []>} : vector<64x64xf32>, vector<64x128xf32>, vector<64x128xf32> -> vector<64x128xf32>
    %c0_3 = arith.constant 0 : index
    %c0_4 = arith.constant 0 : index
    %8 = vector.load %arg2[%c0_3, %c0_4] : memref<32x128xbf16, #tpu.memory_space<vmem>>, vector<32x128xbf16>
    %cst_5 = arith.constant 0.000000e+00 : f32
    %9 = vector.broadcast %cst_5 : f32 to vector<8x32xf32>
    %cst_6 = arith.constant 0.000000e+00 : f32
    %10 = vector.broadcast %cst_6 : f32 to vector<8x32xf32>
    %11 = vector.extract_strided_slice %7 {offsets = [0, 0], sizes = [8, 128], strides = [1, 1]} : vector<64x128xf32> to vector<8x128xf32>
    %12 = arith.truncf %9 : vector<8x32xf32> to vector<8x32xbf16>
    %cst_7 = arith.constant dense<0.000000e+00> : vector<8x128xf32>
    %13 = tpu.matmul %12, %8, %cst_7 {dimension_numbers = #tpu.dot_dimension_numbers<[1], [0], [0], [1], [0, 0, 1, 1], [], []>} : vector<8x32xbf16>, vector<32x128xbf16>, vector<8x128xf32> -> vector<8x128xf32>
    %14 = arith.addf %11, %13 : vector<8x128xf32>
    %15 = arith.negf %14 : vector<8x128xf32>
    %16 = math.exp %15 : vector<8x128xf32>
    %cst_8 = arith.constant 1.000000e+00 : f32
    %17 = vector.broadcast %cst_8 : f32 to vector<8x128xf32>
    %18 = arith.addf %17, %16 : vector<8x128xf32>
    %19 = arith.divf %17, %18 : vector<8x128xf32>
    %20 = vector.extract_strided_slice %19 {offsets = [0, 0], sizes = [8, 32], strides = [1, 1]} : vector<8x128xf32> to vector<8x32xf32>
    %21 = vector.extract_strided_slice %19 {offsets = [0, 32], sizes = [8, 32], strides = [1, 1]} : vector<8x128xf32> to vector<8x32xf32>
    %22 = vector.extract_strided_slice %19 {offsets = [0, 96], sizes = [8, 32], strides = [1, 1]} : vector<8x128xf32> to vector<8x32xf32>
    %23 = vector.extract_strided_slice %14 {offsets = [0, 64], sizes = [8, 32], strides = [1, 1]} : vector<8x128xf32> to vector<8x32xf32>
    %24 = math.tanh %23 : vector<8x32xf32>
    %25 = arith.mulf %21, %10 : vector<8x32xf32>
    %26 = arith.mulf %20, %24 : vector<8x32xf32>
    %27 = arith.addf %25, %26 : vector<8x32xf32>
    %28 = math.tanh %27 : vector<8x32xf32>
    %29 = arith.mulf %22, %28 : vector<8x32xf32>
    %30 = vector.extract_strided_slice %7 {offsets = [8, 0], sizes = [8, 128], strides = [1, 1]} : vector<64x128xf32> to vector<8x128xf32>
    %31 = arith.truncf %29 : vector<8x32xf32> to vector<8x32xbf16>
    %cst_9 = arith.constant dense<0.000000e+00> : vector<8x128xf32>
    %32 = tpu.matmul %31, %8, %cst_9 {dimension_numbers = #tpu.dot_dimension_numbers<[1], [0], [0], [1], [0, 0, 1, 1], [], []>} : vector<8x32xbf16>, vector<32x128xbf16>, vector<8x128xf32> -> vector<8x128xf32>
    %33 = arith.addf %30, %32 : vector<8x128xf32>
    %34 = arith.negf %33 : vector<8x128xf32>
    %35 = math.exp %34 : vector<8x128xf32>
    %cst_10 = arith.constant 1.000000e+00 : f32
    %36 = vector.broadcast %cst_10 : f32 to vector<8x128xf32>
    %37 = arith.addf %36, %35 : vector<8x128xf32>
    %38 = arith.divf %36, %37 : vector<8x128xf32>
    %39 = vector.extract_strided_slice %38 {offsets = [0, 0], sizes = [8, 32], strides = [1, 1]} : vector<8x128xf32> to vector<8x32xf32>
    %40 = vector.extract_strided_slice %38 {offsets = [0, 32], sizes = [8, 32], strides = [1, 1]} : vector<8x128xf32> to vector<8x32xf32>
    %41 = vector.extract_strided_slice %38 {offsets = [0, 96], sizes = [8, 32], strides = [1, 1]} : vector<8x128xf32> to vector<8x32xf32>
    %42 = vector.extract_strided_slice %33 {offsets = [0, 64], sizes = [8, 32], strides = [1, 1]} : vector<8x128xf32> to vector<8x32xf32>
    %43 = math.tanh %42 : vector<8x32xf32>
    %44 = arith.mulf %40, %27 : vector<8x32xf32>
    %45 = arith.mulf %39, %43 : vector<8x32xf32>
    %46 = arith.addf %44, %45 : vector<8x32xf32>
    %47 = math.tanh %46 : vector<8x32xf32>
    %48 = arith.mulf %41, %47 : vector<8x32xf32>
    %49 = vector.extract_strided_slice %7 {offsets = [16, 0], sizes = [8, 128], strides = [1, 1]} : vector<64x128xf32> to vector<8x128xf32>
    %50 = arith.truncf %48 : vector<8x32xf32> to vector<8x32xbf16>
    %cst_11 = arith.constant dense<0.000000e+00> : vector<8x128xf32>
    %51 = tpu.matmul %50, %8, %cst_11 {dimension_numbers = #tpu.dot_dimension_numbers<[1], [0], [0], [1], [0, 0, 1, 1], [], []>} : vector<8x32xbf16>, vector<32x128xbf16>, vector<8x128xf32> -> vector<8x128xf32>
    %52 = arith.addf %49, %51 : vector<8x128xf32>
    %53 = arith.negf %52 : vector<8x128xf32>
    %54 = math.exp %53 : vector<8x128xf32>
    %cst_12 = arith.constant 1.000000e+00 : f32
    %55 = vector.broadcast %cst_12 : f32 to vector<8x128xf32>
    %56 = arith.addf %55, %54 : vector<8x128xf32>
    %57 = arith.divf %55, %56 : vector<8x128xf32>
    %58 = vector.extract_strided_slice %57 {offsets = [0, 0], sizes = [8, 32], strides = [1, 1]} : vector<8x128xf32> to vector<8x32xf32>
    %59 = vector.extract_strided_slice %57 {offsets = [0, 32], sizes = [8, 32], strides = [1, 1]} : vector<8x128xf32> to vector<8x32xf32>
    %60 = vector.extract_strided_slice %57 {offsets = [0, 96], sizes = [8, 32], strides = [1, 1]} : vector<8x128xf32> to vector<8x32xf32>
    %61 = vector.extract_strided_slice %52 {offsets = [0, 64], sizes = [8, 32], strides = [1, 1]} : vector<8x128xf32> to vector<8x32xf32>
    %62 = math.tanh %61 : vector<8x32xf32>
    %63 = arith.mulf %59, %46 : vector<8x32xf32>
    %64 = arith.mulf %58, %62 : vector<8x32xf32>
    %65 = arith.addf %63, %64 : vector<8x32xf32>
    %66 = math.tanh %65 : vector<8x32xf32>
    %67 = arith.mulf %60, %66 : vector<8x32xf32>
    %68 = vector.extract_strided_slice %7 {offsets = [24, 0], sizes = [8, 128], strides = [1, 1]} : vector<64x128xf32> to vector<8x128xf32>
    %69 = arith.truncf %67 : vector<8x32xf32> to vector<8x32xbf16>
    %cst_13 = arith.constant dense<0.000000e+00> : vector<8x128xf32>
    %70 = tpu.matmul %69, %8, %cst_13 {dimension_numbers = #tpu.dot_dimension_numbers<[1], [0], [0], [1], [0, 0, 1, 1], [], []>} : vector<8x32xbf16>, vector<32x128xbf16>, vector<8x128xf32> -> vector<8x128xf32>
    %71 = arith.addf %68, %70 : vector<8x128xf32>
    %72 = arith.negf %71 : vector<8x128xf32>
    %73 = math.exp %72 : vector<8x128xf32>
    %cst_14 = arith.constant 1.000000e+00 : f32
    %74 = vector.broadcast %cst_14 : f32 to vector<8x128xf32>
    %75 = arith.addf %74, %73 : vector<8x128xf32>
    %76 = arith.divf %74, %75 : vector<8x128xf32>
    %77 = vector.extract_strided_slice %76 {offsets = [0, 0], sizes = [8, 32], strides = [1, 1]} : vector<8x128xf32> to vector<8x32xf32>
    %78 = vector.extract_strided_slice %76 {offsets = [0, 32], sizes = [8, 32], strides = [1, 1]} : vector<8x128xf32> to vector<8x32xf32>
    %79 = vector.extract_strided_slice %76 {offsets = [0, 96], sizes = [8, 32], strides = [1, 1]} : vector<8x128xf32> to vector<8x32xf32>
    %80 = vector.extract_strided_slice %71 {offsets = [0, 64], sizes = [8, 32], strides = [1, 1]} : vector<8x128xf32> to vector<8x32xf32>
    %81 = math.tanh %80 : vector<8x32xf32>
    %82 = arith.mulf %78, %65 : vector<8x32xf32>
    %83 = arith.mulf %77, %81 : vector<8x32xf32>
    %84 = arith.addf %82, %83 : vector<8x32xf32>
    %85 = math.tanh %84 : vector<8x32xf32>
    %86 = arith.mulf %79, %85 : vector<8x32xf32>
    %87 = vector.extract_strided_slice %7 {offsets = [32, 0], sizes = [8, 128], strides = [1, 1]} : vector<64x128xf32> to vector<8x128xf32>
    %88 = arith.truncf %86 : vector<8x32xf32> to vector<8x32xbf16>
    %cst_15 = arith.constant dense<0.000000e+00> : vector<8x128xf32>
    %89 = tpu.matmul %88, %8, %cst_15 {dimension_numbers = #tpu.dot_dimension_numbers<[1], [0], [0], [1], [0, 0, 1, 1], [], []>} : vector<8x32xbf16>, vector<32x128xbf16>, vector<8x128xf32> -> vector<8x128xf32>
    %90 = arith.addf %87, %89 : vector<8x128xf32>
    %91 = arith.negf %90 : vector<8x128xf32>
    %92 = math.exp %91 : vector<8x128xf32>
    %cst_16 = arith.constant 1.000000e+00 : f32
    %93 = vector.broadcast %cst_16 : f32 to vector<8x128xf32>
    %94 = arith.addf %93, %92 : vector<8x128xf32>
    %95 = arith.divf %93, %94 : vector<8x128xf32>
    %96 = vector.extract_strided_slice %95 {offsets = [0, 0], sizes = [8, 32], strides = [1, 1]} : vector<8x128xf32> to vector<8x32xf32>
    %97 = vector.extract_strided_slice %95 {offsets = [0, 32], sizes = [8, 32], strides = [1, 1]} : vector<8x128xf32> to vector<8x32xf32>
    %98 = vector.extract_strided_slice %95 {offsets = [0, 96], sizes = [8, 32], strides = [1, 1]} : vector<8x128xf32> to vector<8x32xf32>
    %99 = vector.extract_strided_slice %90 {offsets = [0, 64], sizes = [8, 32], strides = [1, 1]} : vector<8x128xf32> to vector<8x32xf32>
    %100 = math.tanh %99 : vector<8x32xf32>
    %101 = arith.mulf %97, %84 : vector<8x32xf32>
    %102 = arith.mulf %96, %100 : vector<8x32xf32>
    %103 = arith.addf %101, %102 : vector<8x32xf32>
    %104 = math.tanh %103 : vector<8x32xf32>
    %105 = arith.mulf %98, %104 : vector<8x32xf32>
    %106 = vector.extract_strided_slice %7 {offsets = [40, 0], sizes = [8, 128], strides = [1, 1]} : vector<64x128xf32> to vector<8x128xf32>
    %107 = arith.truncf %105 : vector<8x32xf32> to vector<8x32xbf16>
    %cst_17 = arith.constant dense<0.000000e+00> : vector<8x128xf32>
    %108 = tpu.matmul %107, %8, %cst_17 {dimension_numbers = #tpu.dot_dimension_numbers<[1], [0], [0], [1], [0, 0, 1, 1], [], []>} : vector<8x32xbf16>, vector<32x128xbf16>, vector<8x128xf32> -> vector<8x128xf32>
    %109 = arith.addf %106, %108 : vector<8x128xf32>
    %110 = arith.negf %109 : vector<8x128xf32>
    %111 = math.exp %110 : vector<8x128xf32>
    %cst_18 = arith.constant 1.000000e+00 : f32
    %112 = vector.broadcast %cst_18 : f32 to vector<8x128xf32>
    %113 = arith.addf %112, %111 : vector<8x128xf32>
    %114 = arith.divf %112, %113 : vector<8x128xf32>
    %115 = vector.extract_strided_slice %114 {offsets = [0, 0], sizes = [8, 32], strides = [1, 1]} : vector<8x128xf32> to vector<8x32xf32>
    %116 = vector.extract_strided_slice %114 {offsets = [0, 32], sizes = [8, 32], strides = [1, 1]} : vector<8x128xf32> to vector<8x32xf32>
    %117 = vector.extract_strided_slice %114 {offsets = [0, 96], sizes = [8, 32], strides = [1, 1]} : vector<8x128xf32> to vector<8x32xf32>
    %118 = vector.extract_strided_slice %109 {offsets = [0, 64], sizes = [8, 32], strides = [1, 1]} : vector<8x128xf32> to vector<8x32xf32>
    %119 = math.tanh %118 : vector<8x32xf32>
    %120 = arith.mulf %116, %103 : vector<8x32xf32>
    %121 = arith.mulf %115, %119 : vector<8x32xf32>
    %122 = arith.addf %120, %121 : vector<8x32xf32>
    %123 = math.tanh %122 : vector<8x32xf32>
    %124 = arith.mulf %117, %123 : vector<8x32xf32>
    %125 = vector.extract_strided_slice %7 {offsets = [48, 0], sizes = [8, 128], strides = [1, 1]} : vector<64x128xf32> to vector<8x128xf32>
    %126 = arith.truncf %124 : vector<8x32xf32> to vector<8x32xbf16>
    %cst_19 = arith.constant dense<0.000000e+00> : vector<8x128xf32>
    %127 = tpu.matmul %126, %8, %cst_19 {dimension_numbers = #tpu.dot_dimension_numbers<[1], [0], [0], [1], [0, 0, 1, 1], [], []>} : vector<8x32xbf16>, vector<32x128xbf16>, vector<8x128xf32> -> vector<8x128xf32>
    %128 = arith.addf %125, %127 : vector<8x128xf32>
    %129 = arith.negf %128 : vector<8x128xf32>
    %130 = math.exp %129 : vector<8x128xf32>
    %cst_20 = arith.constant 1.000000e+00 : f32
    %131 = vector.broadcast %cst_20 : f32 to vector<8x128xf32>
    %132 = arith.addf %131, %130 : vector<8x128xf32>
    %133 = arith.divf %131, %132 : vector<8x128xf32>
    %134 = vector.extract_strided_slice %133 {offsets = [0, 0], sizes = [8, 32], strides = [1, 1]} : vector<8x128xf32> to vector<8x32xf32>
    %135 = vector.extract_strided_slice %133 {offsets = [0, 32], sizes = [8, 32], strides = [1, 1]} : vector<8x128xf32> to vector<8x32xf32>
    %136 = vector.extract_strided_slice %133 {offsets = [0, 96], sizes = [8, 32], strides = [1, 1]} : vector<8x128xf32> to vector<8x32xf32>
    %137 = vector.extract_strided_slice %128 {offsets = [0, 64], sizes = [8, 32], strides = [1, 1]} : vector<8x128xf32> to vector<8x32xf32>
    %138 = math.tanh %137 : vector<8x32xf32>
    %139 = arith.mulf %135, %122 : vector<8x32xf32>
    %140 = arith.mulf %134, %138 : vector<8x32xf32>
    %141 = arith.addf %139, %140 : vector<8x32xf32>
    %142 = math.tanh %141 : vector<8x32xf32>
    %143 = arith.mulf %136, %142 : vector<8x32xf32>
    %144 = vector.extract_strided_slice %7 {offsets = [56, 0], sizes = [8, 128], strides = [1, 1]} : vector<64x128xf32> to vector<8x128xf32>
    %145 = arith.truncf %143 : vector<8x32xf32> to vector<8x32xbf16>
    %cst_21 = arith.constant dense<0.000000e+00> : vector<8x128xf32>
    %146 = tpu.matmul %145, %8, %cst_21 {dimension_numbers = #tpu.dot_dimension_numbers<[1], [0], [0], [1], [0, 0, 1, 1], [], []>} : vector<8x32xbf16>, vector<32x128xbf16>, vector<8x128xf32> -> vector<8x128xf32>
    %147 = arith.addf %144, %146 : vector<8x128xf32>
    %148 = arith.negf %147 : vector<8x128xf32>
    %149 = math.exp %148 : vector<8x128xf32>
    %cst_22 = arith.constant 1.000000e+00 : f32
    %150 = vector.broadcast %cst_22 : f32 to vector<8x128xf32>
    %151 = arith.addf %150, %149 : vector<8x128xf32>
    %152 = arith.divf %150, %151 : vector<8x128xf32>
    %153 = vector.extract_strided_slice %152 {offsets = [0, 0], sizes = [8, 32], strides = [1, 1]} : vector<8x128xf32> to vector<8x32xf32>
    %154 = vector.extract_strided_slice %152 {offsets = [0, 32], sizes = [8, 32], strides = [1, 1]} : vector<8x128xf32> to vector<8x32xf32>
    %155 = vector.extract_strided_slice %152 {offsets = [0, 96], sizes = [8, 32], strides = [1, 1]} : vector<8x128xf32> to vector<8x32xf32>
    %156 = vector.extract_strided_slice %147 {offsets = [0, 64], sizes = [8, 32], strides = [1, 1]} : vector<8x128xf32> to vector<8x32xf32>
    %157 = math.tanh %156 : vector<8x32xf32>
    %158 = arith.mulf %154, %141 : vector<8x32xf32>
    %159 = arith.mulf %153, %157 : vector<8x32xf32>
    %160 = arith.addf %158, %159 : vector<8x32xf32>
    %161 = math.tanh %160 : vector<8x32xf32>
    %162 = arith.mulf %155, %161 : vector<8x32xf32>
    %163 = tpu.concatenate %29, %48, %67, %86, %105, %124, %143, %162 in 1 : vector<8x32xf32>, vector<8x32xf32>, vector<8x32xf32>, vector<8x32xf32>, vector<8x32xf32>, vector<8x32xf32>, vector<8x32xf32>, vector<8x32xf32> -> vector<8x256xf32>
    %164 = arith.truncf %163 : vector<8x256xf32> to vector<8x256xbf16>
    %c0_23 = arith.constant 0 : index
    %c0_24 = arith.constant 0 : index
    %165 = vector.load %arg3[%c0_23, %c0_24] : memref<256x128xbf16, #tpu.memory_space<vmem>>, vector<256x128xbf16>
    %cst_25 = arith.constant dense<0.000000e+00> : vector<8x128xf32>
    %166 = tpu.matmul %164, %165, %cst_25 {dimension_numbers = #tpu.dot_dimension_numbers<[1], [0], [0], [1], [0, 0, 1, 1], [], []>} : vector<8x256xbf16>, vector<256x128xbf16>, vector<8x128xf32> -> vector<8x128xf32>
    %c0_26 = arith.constant 0 : index
    %c0_27 = arith.constant 0 : index
    %167 = vector.load %arg4[%c0_26, %c0_27] : memref<1x128xf32, #tpu.memory_space<vmem>>, vector<1x128xf32>
    %168 = vector.broadcast %167 : vector<1x128xf32> to vector<8x128xf32>
    %169 = arith.addf %166, %168 : vector<8x128xf32>
    %c0_28 = arith.constant 0 : index
    %c0_29 = arith.constant 0 : index
    %170 = vector.load %arg5[%c0_28, %c0_29] : memref<8x128xf32, #tpu.memory_space<vmem>>, vector<8x128xf32>
    tpu.vector_store %arg5[%c0_28, %c0_29], %169 {strides = array<i32>} : memref<8x128xf32, #tpu.memory_space<vmem>>, vector<8x128xf32>,
    return
  }
}

</mosaic_0001>

<bundles_post_ra>
// kernel: my_model_forward.1
= control target key start
LH: loop header
LB: loop body
LE: loop exit
PB: predicated region body
PF: predicated region fallthrough
CT: control target
= control target key end

     0   :  { %10 = vsyncpa [#allocation3], 0  ;;  %s1385_s18 = smov [#allocation2]   ;;  %s1660_s0 = inlined_call_operand.vmem [shape: s32[64,1], index: 0, kind: input, shape index: {}]   ;;  %s1661_s1 = inlined_call_operand.vmem [shape: f32[64,128], index: 1, kind: input, shape index: {}]   ;;  %s1662_s2 = inlined_call_operand.vmem [shape: bf16[32,128], index: 2, kind: input, shape index: {}]   ;;  %s1663_s3 = inlined_call_operand.hbm [shape: bf16[256,128], index: 3, kind: input, shape index: {}]   ;;  %s1664_s4 = inlined_call_operand.vmem [shape: f32[1,128], index: 4, kind: input, shape index: {}]   ;;  %s1665_s5 = inlined_call_operand.vmem [shape: f32[8,128], index: 5, kind: output, shape index: {}]  }
   0x1   :  { %s22_s19 = sshll.u32 %s1385_s18, 4  ;;  %s1361_s22 = scalar_lea.hbm %s1663_s3, 2048  ;;  %s23_s19 = int_to_ptr.vmem [resolvable:$true] %s22_s19 }
   0x2   :  { %p1362_p0 = scmp.ne.s32.totalorder %s1663_s3, %s1361_s22  ;;  %p1365_p1 = scmp.lt.u32.totalorder %s1361_s22, %s1663_s3 }
   0x4   :  { %p1367_p2 = pnand %p1365_p1, %p1362_p0 }
   0x6   :  { %1370 = shalt.err (!%p1367_p2)
}
   0x7   :  { %s1371_s27 = scalar_lea.vmem %s23_s19, 2048  ;;  %p1376_p4 = scmp.lt.s32.totalorder %s23_s19, %s23_s19 }
   0x8   :  { %p1372_p3 = scmp.ne.s32.totalorder %s23_s19, %s1371_s27  ;;  %p1377_p5 = scmp.lt.s32.totalorder %s1371_s27, %s1371_s27 }
   0xa   :  { %p1378_p6 = por %p1377_p5, %p1376_p4 }
   0xc   :  { %p1379_p7 = pnand %p1378_p6, %p1372_p3 }
   0xe   :  { %1382 = shalt.err (!%p1379_p7)
}
   0xf   :  { %s1386_s28 = smov 64   ;;  %s1387_s29 = smov 4  }
  0x10   :  { %28 = dma.hbm_to_vmem [thread:$0]  %s1663_s3, 2048, %s23_s19, [#allocation3], %s1386_s28, %s1386_s28, %s1387_s29  }
  0x11   :  { %1383 = dma.done.wait [#allocation3], 2048  }
  0x12   :  { %1384 = vsyncadd [#allocation3], 4294965248  ;;  %v1388_v0 = vmov 0   ;;  %v1389_v1 = vmov 0.0   ;;  %v39_v2 = vld [vmem:[%s1660_s0 + $0x10] sm:$0xff]  ;;  %v37_v3 = vld [vmem:[%s1660_s0] sm:$0xff]  ;;  %v35_v24 = vlaneseq }
  0x13   :  { %1263 = vset.pattern.permute.xlu1 %v1388_v0  ;;  %1262 = vset.pattern.permute.xlu0 %v1388_v0  ;;  %v40_v4 = vld [vmem:[%s1660_s0 + $0x18] sm:$0xff]  ;;  %v38_v5 = vld [vmem:[%s1660_s0 + $0x8] sm:$0xff]  ;;  %v93_v6 = vld [vmem:[%s1661_s1] sm:$0xff]  ;;  %vm1390_vm0 = vmmov 0   ;;  %vm101_vm1 = vcmask 523264   ;;  %vm247_vm10 = vcmask 261120  }
  0x14   :  { %1182 = vmatprep.subr.bf16.mxu1 %v1389_v1  ;;  %52 = vperm.xlu1 %1263, %v39_v2   ;;  %v94_v7 = vld [vmem:[%s1661_s1 + $0x8] sm:$0xff]  ;;  %v95_v8 = vld [vmem:[%s1661_s1 + $0x10] sm:$0xff]  ;;  %v96_v9 = vld [vmem:[%s1661_s1 + $0x18] sm:$0xff]  ;;  %v36_v25 = vand.u32 127, %v35_v24  ;;  %vm846_vm11 = vcmask 785408  }
  0x15   :  { %46 = vperm.xlu0 %1262, %v37_v3   ;;  %v42_v10 = vld [vmem:[%s1660_s0 + $0x28] sm:$0xff]  ;;  %v41_v11 = vld [vmem:[%s1660_s0 + $0x20] sm:$0xff]  ;;  %v1238_v12 = vpack.c.bf16 %v94_v7, %v93_v6  ;;  %v1242_v13 = vpack.c.bf16 %v96_v9, %v95_v8  ;;  %v99_v16 = vld [vmem:[%s1661_s1 + $0x30] sm:$0xff]  ;;  %1186 = vmatprep.mubr.msk.bf16.mxu1 %vm1390_vm0, %v1389_v1 }
  0x16   :  { %v97_v14 = vld [vmem:[%s1661_s1 + $0x20] sm:$0xff]  ;;  %v98_v15 = vld [vmem:[%s1661_s1 + $0x28] sm:$0xff]  ;;  %v100_v17 = vld [vmem:[%s1661_s1 + $0x38] sm:$0xff] }
  0x17   :  { %1239 = vmatprep.subr.bf16.mxu0 %v1238_v12  ;;  %v1485_v18 = vld [vmem:[%s1662_s2] sm:$0xff]   ;;  %v44_v19 = vld [vmem:[%s1660_s0 + $0x38] sm:$0xff]  ;;  %v43_v20 = vld [vmem:[%s1660_s0 + $0x30] sm:$0xff]  ;;  %v1246_v21 = vpack.c.bf16 %v98_v15, %v97_v14  ;;  %v1250_v22 = vpack.c.bf16 %v100_v17, %v99_v16  ;;  %s1391_s0 = smov 32  }
  0x18   :  { %55 = vperm.xlu1 %1263, %v40_v4   ;;  %1241 = vmatpush3.bf16.msra.mxu0 %v1238_v12  ;;  %v1498_v23 = vld [vmem:[%s1662_s2 + $0x8] sm:$0xff]   ;;  %s1392_s2 = smov 96  }
  0x19   :  { %49 = vperm.xlu0 %1262, %v38_v5   ;;  %1243 = vmatprep.subr.bf16.mxu0 %v1242_v13 }
  0x1a   :  { %1183 = vmatpush3.bf16.msra.mxu1 %v1485_v18 }
  0x1b   :  { %1184 = vmatprep.subr.bf16.mxu1 %v1389_v1 }
  0x1c   :  { %61 = vperm.xlu1 %1263, %v42_v10   ;;  %1245 = vmatpush3.bf16.msra.mxu0 %v1242_v13 }
  0x1d   :  { %58 = vperm.xlu0 %1262, %v41_v11   ;;  %1247 = vmatprep.subr.bf16.mxu0 %v1246_v21 }
  0x1e   :  { %1185 = vmatpush3.bf16.msra.mxu1 %v1498_v23 }
  0x1f   :  { %1190 = vmatprep.subr.bf16.mxu1 %v1389_v1 }
  0x20   :  { %67 = vperm.xlu1 %1263, %v44_v19   ;;  %1249 = vmatpush3.bf16.msra.mxu0 %v1246_v21 }
  0x21   :  { %64 = vperm.xlu0 %1262, %v43_v20   ;;  %1251 = vmatprep.subr.bf16.mxu0 %v1250_v22 }
  0x24   :  { %1253 = vmatpush3.bf16.msra.mxu0 %v1250_v22 }
  0x25   :  { %1174 = vmatprep.subr.bf16.mxu0 %v1389_v1 }
  0x93   :  { %v53_v26 = vpop.permute.xlu1 %52 }
  0x94   :  { %v47_v27 = vpop.permute.xlu0 %46  ;;  %vm71_vm3 = vcmp.eq.s32.totalorder %v36_v25, %v53_v26 }
  0x95   :  { %vm69_vm2 = vcmp.eq.s32.totalorder %v36_v25, %v47_v27  ;;  %v1036_v31 = vsel %vm71_vm3, 1.0, %v1389_v1 }
  0x96   :  { %v1034_v28 = vsel %vm69_vm2, 1.0, %v1389_v1 }
  0x97   :  { %1162 = vmatprep.mubr.msk.f32.mxu0 %vm101_vm1, %v1034_v28  ;;  %v56_v29 = vpop.permute.xlu1 %55 }
  0x98   :  { %v50_v30 = vpop.permute.xlu0 %49  ;;  %vm72_vm5 = vcmp.eq.s32.totalorder %v36_v25, %v56_v29 }
  0x99   :  { %vm70_vm4 = vcmp.eq.s32.totalorder %v36_v25, %v50_v30  ;;  %v1037_v35 = vsel %vm72_vm5, 1.0, %v1389_v1 }
  0x9a   :  { %v1035_v32 = vsel %vm70_vm4, 1.0, %v1389_v1 }
  0x9b   :  { %1163 = vmatmul.mubr.msk.f32.vlgmr.msra.gmra.mrb[0].mxu0 %vm101_vm1, %v1035_v32  ;;  %v62_v33 = vpop.permute.xlu1 %61 }
  0x9c   :  { %1175 = vmatpush3.bf16.msra.mxu0 %v1485_v18  ;;  %1165 = vmatprep.mubr.msk.f32.mxu0 %vm101_vm1, %v1036_v31  ;;  %v59_v34 = vpop.permute.xlu0 %58  ;;  %vm74_vm7 = vcmp.eq.s32.totalorder %v36_v25, %v62_v33 }
  0x9d   :  { %vm73_vm6 = vcmp.eq.s32.totalorder %v36_v25, %v59_v34  ;;  %1176 = vmatprep.subr.bf16.mxu0 %v1389_v1  ;;  %v1039_v39 = vsel %vm74_vm7, 1.0, %v1389_v1 }
  0x9e   :  { %v1038_v36 = vsel %vm73_vm6, 1.0, %v1389_v1 }
  0x9f   :  { %1166 = vmatmul.mubr.msk.f32.gmra.mrb[2].mxu0 %vm101_vm1, %v1037_v35  ;;  %v68_v37 = vpop.permute.xlu1 %67 }
  0xa0   :  { %1168 = vmatprep.mubr.msk.f32.mxu0 %vm101_vm1, %v1038_v36  ;;  %v65_v38 = vpop.permute.xlu0 %64  ;;  %1177 = vmatpush3.bf16.msra.mxu0 %v1498_v23  ;;  %vm76_vm9 = vcmp.eq.s32.totalorder %v36_v25, %v68_v37 }
  0xa1   :  { %vm75_vm8 = vcmp.eq.s32.totalorder %v36_v25, %v65_v38  ;;  %1198 = vmatprep.subr.bf16.mxu0 %v1389_v1  ;;  %v1041_v41 = vsel %vm76_vm9, 1.0, %v1389_v1 }
  0xa2   :  { %v1040_v40 = vsel %vm75_vm8, 1.0, %v1389_v1 }
  0xa3   :  { %1169 = vmatmul.mubr.msk.f32.gmra.mrb[4].mxu0 %vm101_vm1, %v1039_v39 }
  0xa4   :  { %1171 = vmatprep.mubr.msk.f32.mxu0 %vm101_vm1, %v1040_v40 }
  0xa7   :  { %1172 = vmatmul.mubr.msk.f32.gmra.mrb[6].mxu0 %vm101_vm1, %v1041_v41 }
  0xa8   :  { %1178 = vmatprep.mubr.msk.bf16.mxu0 %vm1390_vm0, %v1389_v1 }
  0xab   :  { %1179 = vmatmul.mubr.bf16.vlgmr.msra.gmra.mrb[8].mxu0 %v1388_v0 }
  0xac   :  { %1199 = vmatpush3.bf16.msra.mxu0 %v1485_v18  ;;  %1202 = vmatprep.mubr.msk.bf16.mxu0 %vm1390_vm0, %v1389_v1 }
  0xad   :  { %1200 = vmatprep.subr.bf16.mxu0 %v1389_v1 }
  0xb0   :  { %1201 = vmatpush3.bf16.msra.mxu0 %v1498_v23 }
  0xb1   :  { %1214 = vmatprep.subr.bf16.mxu0 %v1389_v1 }
 0x16e   :  { %v1164_v42 = vpop.f32.mrb[0].mxu0 }
 0x16f   :  { %v192_v43 = vpop.f32.mrb[1].mxu0 }
 0x172   :  { %v1534_v44 = vpop.f32.mrb[2].mxu0 }
 0x173   :  { %v1536_v45 = vpop.f32.mrb[3].mxu0 }
 0x176   :  { %v1538_v46 = vpop.f32.mrb[4].mxu0 }
 0x177   :  { %v1540_v47 = vpop.f32.mrb[5].mxu0 }
 0x17a   :  { %v1542_v48 = vpop.f32.mrb[6].mxu0 }
 0x17b   :  { %v1544_v49 = vpop.f32.mrb[7].mxu0 }
 0x17e   :  { %v285_v50 = vpop.f32.mrb[8].mxu0 }
 0x17f   :  { %v291_v51 = vadd.f32 %v285_v50, %v192_v43  ;;  %v1180_v52 = vpop.f32.mrb[9].mxu0 }
 0x180   :  { %v288_v53 = vpop.f32.mrb[10].mxu0 }
 0x181   :  { %1297 = vtanh.f32 %v291_v51  ;;  %v1181_v54 = vpop.f32.mrb[11].mxu0  ;;  %v1052_v56 = vmul.f32 -1.442695, %v291_v51 }
 0x183   :  { %1299 = vpow2.f32 %v1052_v56 }
 0x18b   :  { %v1298_v55 = vpop.eup %1297 }
 0x18c   :  { %301 = vrot.lane.b32.xlu0 %v1298_v55, %s1386_s28 }
 0x18d   :  { %v1300_v57 = vpop.eup %1299 }
 0x18e   :  { %v295_v58 = vadd.f32 1.0, %v1300_v57 }
 0x190   :  { %1301 = vrcp.f32 %v295_v58 }
 0x19a   :  { %v1302_v59 = vpop.eup %1301 }
 0x19b   :  { %v299_v62 = vmul.f32 0.0, %v1302_v59 }
 0x1fe   :  { %v302_v60 = vpop.permute.xlu0 %301 }
 0x1ff   :  { %v304_v61 = vmul.f32 %v1302_v59, %v302_v60 }
 0x201   :  { %306 = vrot.lane.b32.xlu1 %v304_v61, %s1391_s0 }
 0x273   :  { %v307_v63 = vpop.permute.xlu1 %306 }
 0x274   :  { %v309_v0 = vadd.f32 %v307_v63, %v299_v62 }
 0x276   :  { %1303 = vtanh.f32 %v309_v0 }
 0x280   :  { %v1304_v2 = vpop.eup %1303 }
 0x281   :  { %312 = vrot.lane.b32.xlu0 %v1304_v2, %s1386_s28 }
 0x2f3   :  { %v313_v3 = vpop.permute.xlu0 %312 }
 0x2f4   :  { %v1549_v4 = vmul.f32 %v1302_v59, %v313_v3 }
 0x2f6   :  { %v316_v5 = vpack.c.bf16 %v1549_v4, %v1549_v4 }
 0x2f8   :  { %318 = vrot.lane.b32.xlu1 %v316_v5, %s1391_s0 }
 0x36a   :  { %v319_v6 = vpop.permute.xlu1 %318 }
 0x36b   :  { %1187 = vmatmul.mubr.msk.bf16.vlgmr.msra.gmra.mrb[0].mxu1 %vm247_vm10, %v319_v6 }
 0x36c   :  { %1191 = vmatpush3.bf16.msra.mxu1 %v1485_v18  ;;  %1194 = vmatprep.mubr.msk.bf16.mxu1 %vm1390_vm0, %v1389_v1 }
 0x36d   :  { %1192 = vmatprep.subr.bf16.mxu1 %v1389_v1 }
 0x370   :  { %1193 = vmatpush3.bf16.msra.mxu1 %v1498_v23 }
 0x371   :  { %1206 = vmatprep.subr.bf16.mxu1 %v1389_v1 }
 0x43e   :  { %v357_v7 = vpop.f32.mrb[0].mxu1 }
 0x43f   :  { %v363_v8 = vadd.f32 %v1164_v42, %v357_v7  ;;  %v1188_v9 = vpop.f32.mrb[1].mxu1 }
 0x440   :  { %v360_v10 = vpop.f32.mrb[2].mxu1 }
 0x441   :  { %1305 = vtanh.f32 %v363_v8  ;;  %v1189_v11 = vpop.f32.mrb[3].mxu1  ;;  %v1054_v13 = vmul.f32 -1.442695, %v363_v8 }
 0x443   :  { %1307 = vpow2.f32 %v1054_v13 }
 0x44b   :  { %v1306_v12 = vpop.eup %1305 }
 0x44c   :  { %373 = vrot.lane.b32.xlu0 %v1306_v12, %s1386_s28 }
 0x44d   :  { %v1308_v14 = vpop.eup %1307 }
 0x44e   :  { %v367_v15 = vadd.f32 1.0, %v1308_v14 }
 0x450   :  { %1309 = vrcp.f32 %v367_v15 }
 0x45a   :  { %v1310_v16 = vpop.eup %1309 }
 0x45b   :  { %v371_v20 = vmul.f32 %v1310_v16, %v309_v0 }
 0x4be   :  { %v374_v17 = vpop.permute.xlu0 %373 }
 0x4bf   :  { %v376_v19 = vmul.f32 %v1310_v16, %v374_v17 }
 0x4c1   :  { %378 = vrot.lane.b32.xlu1 %v376_v19, %s1391_s0 }
 0x533   :  { %v379_v21 = vpop.permute.xlu1 %378 }
 0x534   :  { %v381_v22 = vadd.f32 %v379_v21, %v371_v20 }
 0x536   :  { %1311 = vtanh.f32 %v381_v22 }
 0x540   :  { %v1312_v24 = vpop.eup %1311 }
 0x541   :  { %384 = vrot.lane.b32.xlu0 %v1312_v24, %s1386_s28 }
 0x5b3   :  { %v385_v25 = vpop.permute.xlu0 %384 }
 0x5b4   :  { %v1564_v26 = vmul.f32 %v1310_v16, %v385_v25 }
 0x5b6   :  { %v388_v27 = vpack.c.bf16 %v1564_v26, %v1564_v26 }
 0x5b8   :  { %390 = vrot.lane.b32.xlu1 %v388_v27, %s1391_s0 }
 0x62a   :  { %v391_v28 = vpop.permute.xlu1 %390 }
 0x62b   :  { %1195 = vmatmul.mubr.msk.bf16.vlgmr.msra.gmra.mrb[4].mxu1 %vm247_vm10, %v391_v28 }
 0x62c   :  { %1207 = vmatpush3.bf16.msra.mxu1 %v1485_v18  ;;  %1210 = vmatprep.mubr.msk.bf16.mxu1 %vm1390_vm0, %v1389_v1 }
 0x62d   :  { %1208 = vmatprep.subr.bf16.mxu1 %v1389_v1 }
 0x630   :  { %1209 = vmatpush3.bf16.msra.mxu1 %v1498_v23 }
 0x631   :  { %1222 = vmatprep.subr.bf16.mxu1 %v1389_v1 }
 0x6fe   :  { %v429_v29 = vpop.f32.mrb[4].mxu1 }
 0x6ff   :  { %v435_v30 = vadd.f32 %v429_v29, %v1536_v45  ;;  %v1196_v31 = vpop.f32.mrb[5].mxu1 }
 0x700   :  { %v432_v32 = vpop.f32.mrb[6].mxu1 }
 0x701   :  { %1313 = vtanh.f32 %v435_v30  ;;  %v1197_v33 = vpop.f32.mrb[7].mxu1  ;;  %v1056_v35 = vmul.f32 -1.442695, %v435_v30 }
 0x703   :  { %1315 = vpow2.f32 %v1056_v35 }
 0x70b   :  { %v1314_v34 = vpop.eup %1313 }
 0x70c   :  { %445 = vrot.lane.b32.xlu0 %v1314_v34, %s1386_s28 }
 0x70d   :  { %v1316_v36 = vpop.eup %1315 }
 0x70e   :  { %v439_v37 = vadd.f32 1.0, %v1316_v36 }
 0x710   :  { %1317 = vrcp.f32 %v439_v37 }
 0x71a   :  { %v1318_v38 = vpop.eup %1317 }
 0x71b   :  { %v443_v41 = vmul.f32 %v1318_v38, %v381_v22 }
 0x77e   :  { %v446_v39 = vpop.permute.xlu0 %445 }
 0x77f   :  { %v448_v40 = vmul.f32 %v1318_v38, %v446_v39 }
 0x781   :  { %450 = vrot.lane.b32.xlu1 %v448_v40, %s1391_s0 }
 0x7f3   :  { %v451_v42 = vpop.permute.xlu1 %450 }
 0x7f4   :  { %v453_v43 = vadd.f32 %v451_v42, %v443_v41 }
 0x7f6   :  { %1319 = vtanh.f32 %v453_v43 }
 0x800   :  { %v1320_v45 = vpop.eup %1319 }
 0x801   :  { %456 = vrot.lane.b32.xlu0 %v1320_v45, %s1386_s28 }
 0x873   :  { %v457_v50 = vpop.permute.xlu0 %456 }
 0x874   :  { %v1580_v51 = vmul.f32 %v1318_v38, %v457_v50 }
 0x876   :  { %v460_v52 = vpack.c.bf16 %v1580_v51, %v1580_v51 }
 0x878   :  { %462 = vrot.lane.b32.xlu1 %v460_v52, %s1391_s0 }
 0x8ea   :  { %v463_v53 = vpop.permute.xlu1 %462 }
 0x8eb   :  { %1203 = vmatmul.mubr.msk.bf16.vlgmr.msra.gmra.mrb[12].mxu0 %vm247_vm10, %v463_v53 }
 0x8ec   :  { %1215 = vmatpush3.bf16.msra.mxu0 %v1485_v18  ;;  %1218 = vmatprep.mubr.msk.bf16.mxu0 %vm1390_vm0, %v1389_v1 }
 0x8ed   :  { %1216 = vmatprep.subr.bf16.mxu0 %v1389_v1 }
 0x8f0   :  { %1217 = vmatpush3.bf16.msra.mxu0 %v1498_v23 }
 0x8f1   :  { %1230 = vmatprep.subr.bf16.mxu0 %v1389_v1 }
 0x9be   :  { %v501_v54 = vpop.f32.mrb[12].mxu0 }
 0x9bf   :  { %v507_v55 = vadd.f32 %v1534_v44, %v501_v54  ;;  %v1204_v56 = vpop.f32.mrb[13].mxu0 }
 0x9c0   :  { %v504_v57 = vpop.f32.mrb[14].mxu0 }
 0x9c1   :  { %1321 = vtanh.f32 %v507_v55  ;;  %v1205_v58 = vpop.f32.mrb[15].mxu0  ;;  %v1058_v60 = vmul.f32 -1.442695, %v507_v55 }
 0x9c3   :  { %1323 = vpow2.f32 %v1058_v60 }
 0x9cb   :  { %v1322_v59 = vpop.eup %1321 }
 0x9cc   :  { %517 = vrot.lane.b32.xlu0 %v1322_v59, %s1386_s28 }
 0x9cd   :  { %v1324_v61 = vpop.eup %1323 }
 0x9ce   :  { %v511_v62 = vadd.f32 1.0, %v1324_v61 }
 0x9d0   :  { %1325 = vrcp.f32 %v511_v62 }
 0x9da   :  { %v1326_v63 = vpop.eup %1325 }
 0x9db   :  { %v515_v3 = vmul.f32 %v1326_v63, %v453_v43 }
 0xa3e   :  { %v518_v0 = vpop.permute.xlu0 %517 }
 0xa3f   :  { %v520_v2 = vmul.f32 %v1326_v63, %v518_v0 }
 0xa41   :  { %522 = vrot.lane.b32.xlu1 %v520_v2, %s1391_s0 }
 0xab3   :  { %v523_v5 = vpop.permute.xlu1 %522 }
 0xab4   :  { %v525_v44 = vadd.f32 %v523_v5, %v515_v3 }
 0xab6   :  { %1327 = vtanh.f32 %v525_v44 }
 0xac0   :  { %v1328_v6 = vpop.eup %1327 }
 0xac1   :  { %528 = vrot.lane.b32.xlu0 %v1328_v6, %s1386_s28 }
 0xb33   :  { %v529_v7 = vpop.permute.xlu0 %528 }
 0xb34   :  { %v1596_v8 = vmul.f32 %v1326_v63, %v529_v7 }
 0xb36   :  { %v532_v9 = vpack.c.bf16 %v1596_v8, %v1596_v8 }
 0xb38   :  { %534 = vrot.lane.b32.xlu1 %v532_v9, %s1391_s0 }
 0xbaa   :  { %v535_v10 = vpop.permute.xlu1 %534 }
 0xbab   :  { %1211 = vmatmul.mubr.msk.bf16.vlgmr.msra.gmra.mrb[8].mxu1 %vm247_vm10, %v535_v10 }
 0xbac   :  { %1223 = vmatpush3.bf16.msra.mxu1 %v1485_v18  ;;  %1226 = vmatprep.mubr.msk.bf16.mxu1 %vm1390_vm0, %v1389_v1 }
 0xbad   :  { %1224 = vmatprep.subr.bf16.mxu1 %v1389_v1 }
 0xbb0   :  { %1225 = vmatpush3.bf16.msra.mxu1 %v1498_v23 }
 0xc7e   :  { %v573_v11 = vpop.f32.mrb[8].mxu1 }
 0xc7f   :  { %v579_v12 = vadd.f32 %v573_v11, %v1540_v47  ;;  %v1212_v13 = vpop.f32.mrb[9].mxu1 }
 0xc80   :  { %v576_v14 = vpop.f32.mrb[10].mxu1 }
 0xc81   :  { %1329 = vtanh.f32 %v579_v12  ;;  %v1213_v15 = vpop.f32.mrb[11].mxu1  ;;  %v1060_v17 = vmul.f32 -1.442695, %v579_v12 }
 0xc83   :  { %1331 = vpow2.f32 %v1060_v17 }
 0xc8b   :  { %v1330_v16 = vpop.eup %1329 }
 0xc8c   :  { %589 = vrot.lane.b32.xlu0 %v1330_v16, %s1386_s28 }
 0xc8d   :  { %v1332_v19 = vpop.eup %1331 }
 0xc8e   :  { %v583_v20 = vadd.f32 1.0, %v1332_v19 }
 0xc90   :  { %1333 = vrcp.f32 %v583_v20 }
 0xc9a   :  { %v1334_v21 = vpop.eup %1333 }
 0xc9b   :  { %v587_v25 = vmul.f32 %v1334_v21, %v525_v44 }
 0xcfe   :  { %v590_v22 = vpop.permute.xlu0 %589 }
 0xcff   :  { %v592_v24 = vmul.f32 %v1334_v21, %v590_v22 }
 0xd01   :  { %594 = vrot.lane.b32.xlu1 %v592_v24, %s1391_s0 }
 0xd73   :  { %v595_v27 = vpop.permute.xlu1 %594 }
 0xd74   :  { %v597_v47 = vadd.f32 %v595_v27, %v587_v25  ;;  %v1281_v27 = vld [vmem:[#allocation2 + $0x40] sm:$0xff]  }
 0xd75   :  { %1124 = vmatprep.subr.bf16.mxu1 %v1281_v27 }
 0xd76   :  { %1335 = vtanh.f32 %v597_v47 }
 0xd80   :  { %v1336_v28 = vpop.eup %1335 }
 0xd81   :  { %600 = vrot.lane.b32.xlu0 %v1336_v28, %s1386_s28  ;;  %v1283_v28 = vld [vmem:[#allocation2 + $0x48] sm:$0xff]  }
 0xdf3   :  { %v601_v29 = vpop.permute.xlu0 %600 }
 0xdf4   :  { %v1611_v30 = vmul.f32 %v1334_v21, %v601_v29 }
 0xdf6   :  { %v604_v31 = vpack.c.bf16 %v1611_v30, %v1611_v30 }
 0xdf8   :  { %606 = vrot.lane.b32.xlu1 %v604_v31, %s1391_s0  ;;  %v1284_v31 = vld [vmem:[#allocation2 + $0x8] sm:$0xff]  }
 0xe6a   :  { %v607_v32 = vpop.permute.xlu1 %606 }
 0xe6b   :  { %1219 = vmatmul.mubr.msk.bf16.vlgmr.msra.gmra.mrb[16].mxu0 %vm247_vm10, %v607_v32  ;;  %v1285_v32 = vld [vmem:[#allocation2 + $0x50] sm:$0xff]  }
 0xe6c   :  { %1231 = vmatpush3.bf16.msra.mxu0 %v1485_v18  ;;  %1234 = vmatprep.mubr.msk.bf16.mxu0 %vm1390_vm0, %v1389_v1 }
 0xe6d   :  { %1232 = vmatprep.subr.bf16.mxu0 %v1389_v1 }
 0xe70   :  { %1233 = vmatpush3.bf16.msra.mxu0 %v1498_v23 }
 0xf3e   :  { %v645_v33 = vpop.f32.mrb[16].mxu0 }
 0xf3f   :  { %v651_v34 = vadd.f32 %v1538_v46, %v645_v33  ;;  %v1220_v35 = vpop.f32.mrb[17].mxu0  ;;  %v1286_v33 = vld [vmem:[#allocation2 + $0x10] sm:$0xff]  }
 0xf40   :  { %v648_v36 = vpop.f32.mrb[18].mxu0  ;;  %v1290_v35 = vld [vmem:[#allocation2 + $0x20] sm:$0xff]  }
 0xf41   :  { %1337 = vtanh.f32 %v651_v34  ;;  %v1221_v37 = vpop.f32.mrb[19].mxu0  ;;  %v1062_v39 = vmul.f32 -1.442695, %v651_v34  ;;  %v1287_v34 = vld [vmem:[#allocation2 + $0x58] sm:$0xff]   ;;  %v1291_v36 = vld [vmem:[#allocation2 + $0x68] sm:$0xff]  }
 0xf43   :  { %1339 = vpow2.f32 %v1062_v39 }
 0xf4b   :  { %v1338_v38 = vpop.eup %1337 }
 0xf4c   :  { %661 = vrot.lane.b32.xlu0 %v1338_v38, %s1386_s28  ;;  %v1292_v38 = vld [vmem:[#allocation2 + $0x28] sm:$0xff]  }
 0xf4d   :  { %v1340_v18 = vpop.eup %1339 }
 0xf4e   :  { %v655_v40 = vadd.f32 1.0, %v1340_v18  ;;  %v1293_v18 = vld [vmem:[#allocation2 + $0x70] sm:$0xff]  }
 0xf50   :  { %1341 = vrcp.f32 %v655_v40  ;;  %v1294_v40 = vld [vmem:[#allocation2 + $0x30] sm:$0xff]  }
 0xf5a   :  { %v1342_v41 = vpop.eup %1341 }
 0xf5b   :  { %v659_v23 = vmul.f32 %v1342_v41, %v597_v47  ;;  %v1282_v47 = vld [vmem:[#allocation2] sm:$0xff]  }
 0xfbe   :  { %v662_v42 = vpop.permute.xlu0 %661 }
 0xfbf   :  { %v664_v1 = vmul.f32 %v1342_v41, %v662_v42  ;;  %v1296_v42 = vld [vmem:[#allocation2 + $0x38] sm:$0xff]  }
 0xfc1   :  { %666 = vrot.lane.b32.xlu1 %v664_v1, %s1391_s0 }
0x1033   :  { %v667_v43 = vpop.permute.xlu1 %666 }
0x1034   :  { %v669_v46 = vadd.f32 %v667_v43, %v659_v23 }
0x1036   :  { %1343 = vtanh.f32 %v669_v46 }
0x1040   :  { %v1344_v45 = vpop.eup %1343 }
0x1041   :  { %672 = vrot.lane.b32.xlu0 %v1344_v45, %s1386_s28 }
0x10b3   :  { %v673_v50 = vpop.permute.xlu0 %672 }
0x10b4   :  { %v1626_v52 = vmul.f32 %v1342_v41, %v673_v50  ;;  %v1295_v41 = vld [vmem:[#allocation2 + $0x78] sm:$0xff]  }
0x10b6   :  { %v676_v53 = vpack.c.bf16 %v1626_v52, %v1626_v52  ;;  %v1269_v23 = vpack.i.bf16 %v1564_v26, %v1626_v52 }
0x10b8   :  { %678 = vrot.lane.b32.xlu1 %v676_v53, %s1391_s0 }
0x112a   :  { %v679_v54 = vpop.permute.xlu1 %678 }
0x112b   :  { %1227 = vmatmul.mubr.msk.bf16.vlgmr.msra.gmra.mrb[12].mxu1 %vm247_vm10, %v679_v54 }
0x112c   :  { %1125 = vmatpush3.bf16.msra.mxu1 %v1282_v47 }
0x112d   :  { %1126 = vmatprep.subr.bf16.mxu1 %v1283_v28 }
0x1130   :  { %1127 = vmatpush3.bf16.msra.mxu1 %v1284_v31 }
0x1131   :  { %1128 = vmatprep.subr.bf16.mxu1 %v1285_v32 }
0x1134   :  { %1129 = vmatpush3.bf16.msra.mxu1 %v1286_v33 }
0x1135   :  { %1130 = vmatprep.subr.bf16.mxu1 %v1287_v34 }
0x11fe   :  { %v717_v55 = vpop.f32.mrb[12].mxu1 }
0x11ff   :  { %v723_v56 = vadd.f32 %v717_v55, %v1544_v49  ;;  %v1228_v57 = vpop.f32.mrb[13].mxu1 }
0x1200   :  { %v720_v58 = vpop.f32.mrb[14].mxu1 }
0x1201   :  { %1345 = vtanh.f32 %v723_v56  ;;  %v1229_v59 = vpop.f32.mrb[15].mxu1  ;;  %v1064_v61 = vmul.f32 -1.442695, %v723_v56 }
0x1203   :  { %1347 = vpow2.f32 %v1064_v61 }
0x120b   :  { %v1346_v60 = vpop.eup %1345 }
0x120c   :  { %733 = vrot.lane.b32.xlu0 %v1346_v60, %s1386_s28 }
0x120d   :  { %v1348_v62 = vpop.eup %1347 }
0x120e   :  { %v727_v63 = vadd.f32 1.0, %v1348_v62 }
0x1210   :  { %1349 = vrcp.f32 %v727_v63 }
0x121a   :  { %v1350_v0 = vpop.eup %1349 }
0x121b   :  { %v731_v5 = vmul.f32 %v1350_v0, %v669_v46 }
0x127e   :  { %v734_v2 = vpop.permute.xlu0 %733 }
0x127f   :  { %v736_v3 = vmul.f32 %v1350_v0, %v734_v2 }
0x1281   :  { %738 = vrot.lane.b32.xlu1 %v736_v3, %s1391_s0 }
0x12f3   :  { %v739_v44 = vpop.permute.xlu1 %738 }
0x12f4   :  { %v741_v49 = vadd.f32 %v739_v44, %v731_v5  ;;  %v1067_v5 = vld [vmem:[%s1664_s4] ss:$0 sm:$0xff] }
0x12f6   :  { %1351 = vtanh.f32 %v741_v49 }
0x1300   :  { %v1352_v6 = vpop.eup %1351 }
0x1301   :  { %744 = vrot.lane.b32.xlu0 %v1352_v6, %s1386_s28 }
0x1373   :  { %v745_v7 = vpop.permute.xlu0 %744 }
0x1374   :  { %v747_v9 = vmul.f32 %v1350_v0, %v745_v7 }
0x1376   :  { %v748_v10 = vpack.c.bf16 %v747_v9, %v747_v9  ;;  %v1274_v29 = vpack.i.bf16 %v1580_v51, %v747_v9 }
0x1378   :  { %750 = vrot.lane.b32.xlu1 %v748_v10, %s1391_s0 }
0x13ea   :  { %v751_v11 = vpop.permute.xlu1 %750 }
0x13eb   :  { %1235 = vmatmul.mubr.msk.bf16.vlgmr.msra.gmra.mrb[20].mxu0 %vm247_vm10, %v751_v11 }
0x14be   :  { %v789_v12 = vpop.f32.mrb[20].mxu0 }
0x14bf   :  { %v795_v13 = vadd.f32 %v1542_v48, %v789_v12  ;;  %v1236_v14 = vpop.f32.mrb[21].mxu0  ;;  %v1264_v48 = vpack.i.bf16 %v1549_v4, %v1611_v30  ;;  %v1288_v4 = vld [vmem:[#allocation2 + $0x18] sm:$0xff]   ;;  %v1289_v30 = vld [vmem:[#allocation2 + $0x60] sm:$0xff]  }
0x14c0   :  { %v792_v15 = vpop.f32.mrb[22].mxu0  ;;  %1131 = vmatpush3.bf16.msra.mxu1 %v1288_v4 }
0x14c1   :  { %1353 = vtanh.f32 %v795_v13  ;;  %v1237_v16 = vpop.f32.mrb[23].mxu0  ;;  %v1066_v19 = vmul.f32 -1.442695, %v795_v13  ;;  %1132 = vmatprep.subr.bf16.mxu1 %v1289_v30 }
0x14c3   :  { %1355 = vpow2.f32 %v1066_v19 }
0x14c4   :  { %1133 = vmatpush3.bf16.msra.mxu1 %v1290_v35 }
0x14c5   :  { %1134 = vmatprep.subr.bf16.mxu1 %v1291_v36 }
0x14c8   :  { %1135 = vmatpush3.bf16.msra.mxu1 %v1292_v38 }
0x14c9   :  { %1136 = vmatprep.subr.bf16.mxu1 %v1293_v18 }
0x14cb   :  { %v1354_v17 = vpop.eup %1353 }
0x14cc   :  { %805 = vrot.lane.b32.xlu0 %v1354_v17, %s1386_s28  ;;  %1137 = vmatpush3.bf16.msra.mxu1 %v1294_v40 }
0x14cd   :  { %v1356_v20 = vpop.eup %1355  ;;  %1138 = vmatprep.subr.bf16.mxu1 %v1295_v41 }
0x14ce   :  { %v799_v21 = vadd.f32 1.0, %v1356_v20 }
0x14d0   :  { %1357 = vrcp.f32 %v799_v21  ;;  %1139 = vmatpush3.bf16.msra.mxu1 %v1296_v42 }
0x14da   :  { %v1358_v22 = vpop.eup %1357 }
0x14db   :  { %v803_v51 = vmul.f32 %v1358_v22, %v741_v49 }
0x153e   :  { %v806_v24 = vpop.permute.xlu0 %805 }
0x153f   :  { %v808_v25 = vmul.f32 %v1358_v22, %v806_v24 }
0x1541   :  { %810 = vrot.lane.b32.xlu1 %v808_v25, %s1391_s0 }
0x1545   :  { %1265 = vrot.lane.b32.xlu1 %v1264_v48, %s1391_s0 }
0x1549   :  { %1275 = vrot.lane.b32.xlu1 %v1274_v29, %s1392_s2 }
0x15b3   :  { %v811_v37 = vpop.permute.xlu1 %810 }
0x15b4   :  { %v813_v39 = vadd.f32 %v811_v37, %v803_v51 }
0x15b6   :  { %1359 = vtanh.f32 %v813_v39 }
0x15b7   :  { %v1266_v43 = vpop.permute.xlu1 %1265 }
0x15b8   :  { %v1268_v53 = vunpack.i.h.bf16 %v1266_v43  ;;  %v1267_v54 = vunpack.i.l.bf16 %v1266_v43 }
0x15bb   :  { %v1276_v45 = vpop.permute.xlu1 %1275 }
0x15bc   :  { %v1278_v57 = vunpack.i.h.bf16 %v1276_v45  ;;  %v1277_v58 = vunpack.i.l.bf16 %v1276_v45 }
0x15c0   :  { %v1360_v1 = vpop.eup %1359 }
0x15c1   :  { %816 = vrot.lane.b32.xlu0 %v1360_v1, %s1386_s28 }
0x15c5   :  { %1270 = vrot.lane.b32.xlu0 %v1269_v23, %s1386_s28 }
0x1633   :  { %v817_v46 = vpop.permute.xlu0 %816 }
0x1634   :  { %v819_v59 = vmul.f32 %v1358_v22, %v817_v46 }
0x1637   :  { %v1271_v50 = vpop.permute.xlu0 %1270 }
0x1638   :  { %v1273_v55 = vunpack.i.h.bf16 %v1271_v50  ;;  %v1272_v56 = vunpack.i.l.bf16 %v1271_v50 }
0x163a   :  { %v844_v60 = vsel %vm247_vm10, %v1268_v53, %v1273_v55  ;;  %v848_v61 = vsel %vm247_vm10, %v1267_v54, %v1272_v56 }
0x163b   :  { %v845_v26 = vsel %vm101_vm1, %v844_v60, %v1278_v57  ;;  %v849_v52 = vsel %vm101_vm1, %v848_v61, %v1277_v58 }
0x163c   :  { %v850_v62 = vsel %vm846_vm11, %v849_v52, %v819_v59  ;;  %v847_v63 = vsel %vm846_vm11, %v845_v26, %v1596_v8 }
0x163d   :  { %v852_v0 = vpack.c.bf16 %v850_v62, %v850_v62  ;;  %v851_v2 = vpack.c.bf16 %v847_v63, %v847_v63 }
0x163f   :  { %1020 = vmatprep.mubr.bf16.mxu1 %v852_v0 }
0x1640   :  { %1021 = vmatmul.mubr.bf16.vlgmr.msra.gmra.mrb[16].mxu1 %v851_v2 }
0x1713   :  { %v1140_v3 = vpop.f32.mrb[16].mxu1 }
0x1714   :  { %v1141_v44 = vpop.f32.mrb[17].mxu1 }
0x1715   :  { %v1142_v49 = vadd.f32 %v1141_v44, %v1140_v3  ;;  %v1143_v6 = vpop.f32.mrb[18].mxu1 }
0x1716   :  { %v1144_v7 = vpop.f32.mrb[19].mxu1 }
0x1717   :  { %v1023_v9 = vadd.f32 %v1142_v49, %v1067_v5 }
0x1719   :  { %1028 = vst [vmem:[%s1665_s5] sm:$0xff] %v1023_v9 }
0x171a   :  { %1033 = vsyncpa [#allocation3], 1 }

</bundles_post_ra>
